<compile_context>
chip_gen: v7x
topology: tpu7x:2x2x1
jax: 0.10.0
libtpu: 0.0.40
codegen_flags: <defaults>
</compile_context>

<pallas_src>
import functools

import jax
import jax.numpy as jnp
from jax.experimental import pallas as pl
from jax.experimental.pallas import tpu as pltpu

ACTION_SCALE = 0.5  # (1 - 0) / 2
ACTION_BIAS = 0.5   # (1 + 0) / 2


def _actor_kernel(x_ref, w1_ref, b1_ref, w2_ref, b2_ref, w3_ref, b3_ref, o_ref):
    # In-kernel bf16 casts (VPU work that hides under MXU work); f32 epilogue.
    x = x_ref[...].astype(jnp.bfloat16)

    # fc1 + relu  (bf16 x bf16 -> f32 accumulate on MXU)
    h1 = jnp.dot(x, w1_ref[...].astype(jnp.bfloat16),
                 preferred_element_type=jnp.float32)
    h1 = jnp.maximum(h1 + b1_ref[...], 0.0)

    # fc2 + relu
    h2 = jnp.dot(h1.astype(jnp.bfloat16), w2_ref[...].astype(jnp.bfloat16),
                 preferred_element_type=jnp.float32)
    h2 = jnp.maximum(h2 + b2_ref[...], 0.0)

    # fc_mu + tanh + affine (tanh -> EUP slot, affine -> VALU slot).  Output
    # last dim (action_dim < 128) is a masked store; negligible at these sizes.
    mu = jnp.dot(h2.astype(jnp.bfloat16), w3_ref[...].astype(jnp.bfloat16),
                 preferred_element_type=jnp.float32)
    mu = jnp.tanh(mu + b3_ref[...])
    o_ref[...] = (mu * ACTION_SCALE + ACTION_BIAS).astype(o_ref.dtype)


def _cost_estimate(batch, obs_dim, hidden, action_dim, out_dtype):
    flops = 2 * batch * (obs_dim * hidden + hidden * hidden + hidden * action_dim)
    transcendentals = batch * action_dim  # tanh
    out_bytes = jnp.dtype(out_dtype).itemsize
    bytes_accessed = (
        batch * obs_dim * 4                                                # x (f32)
        + (obs_dim * hidden + hidden * hidden + hidden * action_dim) * 4  # W (f32)
        + (hidden + hidden + action_dim) * 4                              # biases
        + batch * action_dim * out_bytes                                  # output
    )
    return pl.CostEstimate(flops=flops, transcendentals=transcendentals,
                           bytes_accessed=bytes_accessed)


@functools.partial(jax.jit, static_argnames=("block_batch", "out_dtype"))
def actor_forward(x, w1, b1, w2, b2, w3, b3, *, block_batch=2048,
                  out_dtype=jnp.float32):
    assert block_batch % 8 == 0, "block_batch must be sublane-aligned (x8)"
    batch, obs_dim = x.shape
    hidden = w1.shape[1]
    action_dim = w3.shape[1]

    cost = _cost_estimate(batch, obs_dim, hidden, action_dim, out_dtype)
    out_shape = jax.ShapeDtypeStruct((batch, action_dim), out_dtype)

    if batch <= block_batch:
        # Small/medium batch: single grid=() invocation, full-array blocks,
        # zero extra XLA ops around the kernel (lowest launch latency).
        full = lambda a: pl.BlockSpec(a.shape, lambda: (0,) * a.ndim)
        return pl.pallas_call(
            _actor_kernel,
            out_shape=out_shape,
            grid_spec=pl.GridSpec(
                grid=(),
                in_specs=[full(x), full(w1), full(b1), full(w2), full(b2),
                          full(w3), full(b3)],
                out_specs=pl.BlockSpec((batch, action_dim), lambda: (0, 0)),
            ),
            cost_estimate=cost,
            compiler_params=pltpu.CompilerParams(),
        )(x, w1, b1, w2, b2, w3, b3)

    # Large batch: tile the batch axis with a big tile.  Weights/biases use
    # constant index maps so they stay VMEM-resident across grid steps; x/out
    # blocks pipeline HBM<->VMEM against MXU work.  The ragged last block is
    # handled by Pallas (masked output DMA), so no pad/slice passes are needed.
    tm = block_batch
    n_blocks = pl.cdiv(batch, tm)

    resident = lambda a: pl.BlockSpec(a.shape, lambda i: (0,) * a.ndim)
    # TODO(synk): on v7x, verify in xprof that both TensorCores are engaged;
    # if not, switch to an explicit core split (leading grid axis of size 2
    # marked pltpu.CORE_PARALLEL).
    return pl.pallas_call(
        _actor_kernel,
        out_shape=out_shape,
        grid_spec=pl.GridSpec(
            grid=(n_blocks,),
            in_specs=[pl.BlockSpec((tm, obs_dim), lambda i: (i, 0)),
                      resident(w1), resident(b1),
                      resident(w2), resident(b2),
                      resident(w3), resident(b3)],
            out_specs=pl.BlockSpec((tm, action_dim), lambda i: (i, 0)),
        ),
        cost_estimate=cost,
        compiler_params=pltpu.CompilerParams(
            dimension_semantics=("parallel",)),
    )(x, w1, b1, w2, b2, w3, b3)


def init_actor_params(key, obs_dim, hidden, action_dim):
    """Deterministic torch.nn.Linear-style init (uniform(-1/sqrt(fan_in), +))."""
    ks = jax.random.split(key, 6)

    def linear(kw, kb, fan_in, fan_out):
        bound = 1.0 / jnp.sqrt(fan_in)
        w = jax.random.uniform(kw, (fan_in, fan_out), jnp.float32, -bound, bound)
        b = jax.random.uniform(kb, (1, fan_out), jnp.float32, -bound, bound)
        return w, b

    w1, b1 = linear(ks[0], ks[1], obs_dim, hidden)
    w2, b2 = linear(ks[2], ks[3], hidden, hidden)
    w3, b3 = linear(ks[4], ks[5], hidden, action_dim)
    return w1, b1, w2, b2, w3, b3


def actor_reference(x, w1, b1, w2, b2, w3, b3):
    # Mirror the kernel's precision policy: bf16 matmul inputs, f32 accumulate
    # and f32 epilogue.
    f = lambda a: a.astype(jnp.bfloat16).astype(jnp.float32)
    h1 = jnp.maximum(f(x) @ f(w1) + b1, 0.0)
    h2 = jnp.maximum(f(h1) @ f(w2) + b2, 0.0)
    mu = jnp.tanh(f(h2) @ f(w3) + b3)
    return mu * ACTION_SCALE + ACTION_BIAS


if __name__ == "__main__":
    key = jax.random.PRNGKey(0)
    k_x, k_p, k_big = jax.random.split(key, 3)

    batch = 2
    obs_dim = 16            # observation_space_size
    hidden = 32             # args.actor_model_size
    action_dim = 8          # action_space_size

    x = jax.random.normal(k_x, (batch, obs_dim), dtype=jnp.float32)
    params = init_actor_params(k_p, obs_dim, hidden, action_dim)

    # Small-batch path (single grid=() invocation).
    out = actor_forward(x, *params)
    jax.block_until_ready(out)
    ref = actor_reference(x, *params)
    assert out.shape == (batch, action_dim)
    assert out.dtype == jnp.float32
    assert jnp.allclose(out, ref, atol=1e-4, rtol=1e-4)

    # Large-batch path (batch-tiled grid with ragged last block, resident
    # weights, no pad/slice around the kernel).
    big_batch = 2048 + 24   # > block_batch default -> tiled path, ragged tail
    x_big = jax.random.normal(k_big, (big_batch, obs_dim), dtype=jnp.float32)
    out_big = actor_forward(x_big, *params)
    jax.block_until_ready(out_big)
    ref_big = actor_reference(x_big, *params)
    assert out_big.shape == (big_batch, action_dim)
    assert jnp.allclose(out_big, ref_big, atol=1e-4, rtol=1e-4)

    # Optional bf16 output path (halves output writeback; caller-selectable).
    out_bf16 = actor_forward(x_big, *params, out_dtype=jnp.bfloat16)
    jax.block_until_ready(out_bf16)
    assert out_bf16.dtype == jnp.bfloat16
    assert jnp.allclose(out_bf16.astype(jnp.float32), ref_big, atol=1e-2, rtol=1e-2)

    print("KERNEL_OK")
</pallas_src>

<mosaic_0001>
module attributes {stable_mosaic.version = 11 : i64} {
  func.func @_actor_kernel(%arg0: memref<2x16xf32, #tpu.memory_space<vmem>>, %arg1: memref<16x32xf32, #tpu.memory_space<vmem>>, %arg2: memref<1x32xf32, #tpu.memory_space<vmem>>, %arg3: memref<32x32xf32, #tpu.memory_space<vmem>>, %arg4: memref<1x32xf32, #tpu.memory_space<vmem>>, %arg5: memref<32x8xf32, #tpu.memory_space<vmem>>, %arg6: memref<1x8xf32, #tpu.memory_space<vmem>>, %arg7: memref<2x8xf32, #tpu.memory_space<vmem>>) attributes {dimension_semantics = [], scalar_prefetch = 0 : i64, scratch_operands = 0 : i64, tpu.core_type = #tpu.core_type<tc>} {
    %c0 = arith.constant 0 : index
    %c0_0 = arith.constant 0 : index
    %0 = vector.load %arg0[%c0, %c0_0] : memref<2x16xf32, #tpu.memory_space<vmem>>, vector<2x16xf32>
    %1 = arith.truncf %0 : vector<2x16xf32> to vector<2x16xbf16>
    %c0_1 = arith.constant 0 : index
    %c0_2 = arith.constant 0 : index
    %2 = vector.load %arg1[%c0_1, %c0_2] : memref<16x32xf32, #tpu.memory_space<vmem>>, vector<16x32xf32>
    %3 = arith.truncf %2 : vector<16x32xf32> to vector<16x32xbf16>
    %cst = arith.constant dense<0.000000e+00> : vector<2x32xf32>
    %4 = tpu.matmul %1, %3, %cst {dimension_numbers = #tpu.dot_dimension_numbers<[1], [0], [0], [1], [0, 0, 1, 1], [], []>} : vector<2x16xbf16>, vector<16x32xbf16>, vector<2x32xf32> -> vector<2x32xf32>
    %c0_3 = arith.constant 0 : index
    %c0_4 = arith.constant 0 : index
    %5 = vector.load %arg2[%c0_3, %c0_4] : memref<1x32xf32, #tpu.memory_space<vmem>>, vector<1x32xf32>
    %6 = vector.broadcast %5 : vector<1x32xf32> to vector<2x32xf32>
    %7 = arith.addf %4, %6 : vector<2x32xf32>
    %cst_5 = arith.constant 0.000000e+00 : f32
    %8 = vector.broadcast %cst_5 : f32 to vector<2x32xf32>
    %9 = arith.maximumf %7, %8 : vector<2x32xf32>
    %10 = arith.truncf %9 : vector<2x32xf32> to vector<2x32xbf16>
    %c0_6 = arith.constant 0 : index
    %c0_7 = arith.constant 0 : index
    %11 = vector.load %arg3[%c0_6, %c0_7] : memref<32x32xf32, #tpu.memory_space<vmem>>, vector<32x32xf32>
    %12 = arith.truncf %11 : vector<32x32xf32> to vector<32x32xbf16>
    %cst_8 = arith.constant dense<0.000000e+00> : vector<2x32xf32>
    %13 = tpu.matmul %10, %12, %cst_8 {dimension_numbers = #tpu.dot_dimension_numbers<[1], [0], [0], [1], [0, 0, 1, 1], [], []>} : vector<2x32xbf16>, vector<32x32xbf16>, vector<2x32xf32> -> vector<2x32xf32>
    %c0_9 = arith.constant 0 : index
    %c0_10 = arith.constant 0 : index
    %14 = vector.load %arg4[%c0_9, %c0_10] : memref<1x32xf32, #tpu.memory_space<vmem>>, vector<1x32xf32>
    %15 = vector.broadcast %14 : vector<1x32xf32> to vector<2x32xf32>
    %16 = arith.addf %13, %15 : vector<2x32xf32>
    %cst_11 = arith.constant 0.000000e+00 : f32
    %17 = vector.broadcast %cst_11 : f32 to vector<2x32xf32>
    %18 = arith.maximumf %16, %17 : vector<2x32xf32>
    %19 = arith.truncf %18 : vector<2x32xf32> to vector<2x32xbf16>
    %c0_12 = arith.constant 0 : index
    %c0_13 = arith.constant 0 : index
    %20 = vector.load %arg5[%c0_12, %c0_13] : memref<32x8xf32, #tpu.memory_space<vmem>>, vector<32x8xf32>
    %21 = arith.truncf %20 : vector<32x8xf32> to vector<32x8xbf16>
    %cst_14 = arith.constant dense<0.000000e+00> : vector<2x8xf32>
    %22 = tpu.matmul %19, %21, %cst_14 {dimension_numbers = #tpu.dot_dimension_numbers<[1], [0], [0], [1], [0, 0, 1, 1], [], []>} : vector<2x32xbf16>, vector<32x8xbf16>, vector<2x8xf32> -> vector<2x8xf32>
    %c0_15 = arith.constant 0 : index
    %c0_16 = arith.constant 0 : index
    %23 = vector.load %arg6[%c0_15, %c0_16] : memref<1x8xf32, #tpu.memory_space<vmem>>, vector<1x8xf32>
    %24 = vector.broadcast %23 : vector<1x8xf32> to vector<2x8xf32>
    %25 = arith.addf %22, %24 : vector<2x8xf32>
    %26 = math.tanh %25 : vector<2x8xf32>
    %cst_17 = arith.constant 5.000000e-01 : f32
    %27 = vector.broadcast %cst_17 : f32 to vector<2x8xf32>
    %28 = arith.mulf %26, %27 : vector<2x8xf32>
    %cst_18 = arith.constant 5.000000e-01 : f32
    %29 = vector.broadcast %cst_18 : f32 to vector<2x8xf32>
    %30 = arith.addf %28, %29 : vector<2x8xf32>
    %c0_19 = arith.constant 0 : index
    %c0_20 = arith.constant 0 : index
    %31 = vector.load %arg7[%c0_19, %c0_20] : memref<2x8xf32, #tpu.memory_space<vmem>>, vector<2x8xf32>
    tpu.vector_store %arg7[%c0_19, %c0_20], %30 {strides = array<i32>} : memref<2x8xf32, #tpu.memory_space<vmem>>, vector<2x8xf32>,
    return
  }
}

</mosaic_0001>

<bundles_post_ra>
// kernel: actor_forward.1
= control target key start
LH: loop header
LB: loop body
LE: loop exit
PB: predicated region body
PF: predicated region fallthrough
CT: control target
= control target key end

     0   :  { %12 = vsyncpa [#allocation3], 0  ;;  %s478_s0 = inlined_call_operand.vmem [shape: f32[2,16], index: 0, kind: input, shape index: {}]   ;;  %s479_s1 = inlined_call_operand.vmem [shape: f32[16,32], index: 1, kind: input, shape index: {}]   ;;  %s480_s2 = inlined_call_operand.hbm [shape: f32[1,32], index: 2, kind: input, shape index: {}]   ;;  %s481_s3 = inlined_call_operand.vmem [shape: f32[32,32], index: 3, kind: input, shape index: {}]   ;;  %s482_s4 = inlined_call_operand.hbm [shape: f32[1,32], index: 4, kind: input, shape index: {}]   ;;  %s483_s5 = inlined_call_operand.vmem [shape: f32[32,8], index: 5, kind: input, shape index: {}]   ;;  %s484_s6 = inlined_call_operand.vmem [shape: f32[1,8], index: 6, kind: input, shape index: {}]   ;;  %s485_s7 = inlined_call_operand.hbm [shape: f32[2,8], index: 7, kind: output, shape index: {}]  }
   0x1   :  { %13 = vsyncpa [#allocation6], 0 }
   0x2   :  { %14 = vsyncpa [#allocation4], 0  ;;  %s361_s24 = smov [#allocation2]   ;;  %s362_s26 = smov [#allocation5]  }
   0x3   :  { %s25_s25 = sshll.u32 %s361_s24, 4  ;;  %s37_s27 = sshll.u32 %s362_s26, 4  ;;  %s26_s25 = int_to_ptr.vmem [resolvable:$true] %s25_s25  ;;  %s38_s27 = int_to_ptr.vmem [resolvable:$true] %s37_s27 }
   0x4   :  { %s289_s30 = scalar_lea.hbm %s480_s2, 16 }
   0x5   :  { %p290_p0 = scmp.ne.s32.totalorder %s480_s2, %s289_s30  ;;  %p293_p1 = scmp.lt.u32.totalorder %s289_s30, %s480_s2 }
   0x7   :  { %p295_p2 = pnand %p293_p1, %p290_p0 }
   0x9   :  { %298 = shalt.err (!%p295_p2)
}
   0xa   :  { %s299_s12 = scalar_lea.vmem %s26_s25, 16  ;;  %s303_s13 = scalar_lea.vmem %s26_s25, 32 }
   0xb   :  { %p300_p3 = scmp.ne.s32.totalorder %s26_s25, %s299_s12  ;;  %p304_p4 = scmp.lt.s32.totalorder %s26_s25, %s26_s25 }
   0xc   :  { %p305_p5 = scmp.lt.s32.totalorder %s303_s13, %s299_s12 }
   0xe   :  { %p306_p6 = por %p305_p5, %p304_p4 }
  0x10   :  { %p307_p7 = pnand %p306_p6, %p300_p3 }
  0x12   :  { %310 = shalt.err (!%p307_p7)
}
  0x13   :  { %28 = dma.hbm_to_vmem [thread:$0]  %s480_s2, 16, %s26_s25, [#allocation3]  }
  0x14   :  { %s311_s18 = scalar_lea.hbm %s482_s4, 16 }
  0x15   :  { %p312_p8 = scmp.ne.s32.totalorder %s482_s4, %s311_s18  ;;  %p315_p9 = scmp.lt.u32.totalorder %s311_s18, %s482_s4 }
  0x17   :  { %p317_p10 = pnand %p315_p9, %p312_p8 }
  0x19   :  { %320 = shalt.err (!%p317_p10)
}
  0x1a   :  { %s321_s23 = scalar_lea.vmem %s38_s27, 16  ;;  %s325_s24 = scalar_lea.vmem %s38_s27, 32 }
  0x1b   :  { %p322_p11 = scmp.ne.s32.totalorder %s38_s27, %s321_s23  ;;  %p326_p12 = scmp.lt.s32.totalorder %s38_s27, %s38_s27 }
  0x1c   :  { %p327_p13 = scmp.lt.s32.totalorder %s325_s24, %s321_s23 }
  0x1e   :  { %p328_p0 = por %p327_p13, %p326_p12 }
  0x20   :  { %p329_p1 = pnand %p328_p0, %p322_p11 }
  0x22   :  { %332 = shalt.err (!%p329_p1)
}
  0x23   :  { %40 = dma.hbm_to_vmem [thread:$0]  %s482_s4, 16, %s38_s27, [#allocation6]  }
  0x24   :  { %355 = dma.done.wait [#allocation3], 16  }
  0x25   :  { %356 = vsyncadd [#allocation3], 4294967280 }
  0x26   :  { %357 = dma.done.wait [#allocation6], 16  }
  0x27   :  { %358 = vsyncadd [#allocation6], 4294967280  ;;  %v363_v0 = vmov 0.0   ;;  %vm364_vm0 = vmmov 0   ;;  %v54_v1 = vld [vmem:[%s479_s1] sm:$0xff]  ;;  %v55_v2 = vld [vmem:[%s479_s1 + $0x8] sm:$0xff] }
  0x28   :  { %260 = vmatprep.subr.bf16.mxu0 %v363_v0  ;;  %262 = vmatprep.mubr.msk.bf16.mxu0 %vm364_vm0, %v363_v0  ;;  %v52_v3 = vld [vmem:[%s478_s0] sm:$0x3]  ;;  %v56_v4 = vpack.c.bf16 %v55_v2, %v54_v1  ;;  %vm64_vm1 = vcmask 130048   ;;  %v111_v7 = vld [vmem:[%s481_s3 + $0x8] sm:$0xff]  ;;  %v112_v9 = vld [vmem:[%s481_s3 + $0x10] sm:$0xff]  ;;  %vm123_vm2 = vcmask 261120  }
  0x29   :  { %266 = vmatprep.subr.bf16.mxu1 %v363_v0  ;;  %270 = vmatprep.mubr.msk.bf16.mxu1 %vm364_vm0, %v363_v0  ;;  %v53_v5 = vpack.c.bf16 %v52_v3, %v52_v3  ;;  %v110_v6 = vld [vmem:[%s481_s3] sm:$0xff]  ;;  %v113_v10 = vld [vmem:[%s481_s3 + $0x18] sm:$0xff]  ;;  %v170_v13 = vld [vmem:[%s483_s5 + $0x8] sm:$0xff]  ;;  %vm228_vm3 = vcmask 58368  }
  0x2a   :  { %261 = vmatpush3.bf16.msra.mxu0 %v56_v4  ;;  %v114_v8 = vpack.c.bf16 %v111_v7, %v110_v6  ;;  %v115_v11 = vpack.c.bf16 %v113_v10, %v112_v9  ;;  %v169_v12 = vld [vmem:[%s483_s5] sm:$0xff]  ;;  %v171_v23 = vld [vmem:[%s483_s5 + $0x10] sm:$0xff]  ;;  %v172_v24 = vld [vmem:[%s483_s5 + $0x18] sm:$0xff]  ;;  %s365_s5 = smov [#allocation7]  }
  0x2b   :  { %274 = vmatprep.subr.bf16.mxu0 %v363_v0  ;;  %v173_v14 = vpack.c.bf16 %v170_v13, %v169_v12  ;;  %v246_v15 = vld [vmem:[#allocation2] ss:$0 sm:$0xff]  ;;  %v174_v25 = vpack.c.bf16 %v172_v24, %v171_v23  ;;  %v248_v26 = vld [vmem:[#allocation5] ss:$0 sm:$0xff]  ;;  %s236_s23 = sshll.u32 %s365_s5, 4  ;;  %s237_s23 = int_to_ptr.vmem [resolvable:$true] %s236_s23 }
  0x2c   :  { %267 = vmatpush3.bf16.msra.mxu1 %v114_v8  ;;  %v250_v34 = vld [vmem:[%s484_s6] ss:$0 sm:$0xff]  ;;  %s333_s24 = scalar_lea.vmem %s237_s23, 32  ;;  %p338_p3 = scmp.lt.s32.totalorder %s237_s23, %s237_s23 }
  0x2d   :  { %263 = vmatmul.mubr.msk.bf16.vlgmr.msra.gmra.mrb[0].mxu0 %vm64_vm1, %v53_v5  ;;  %268 = vmatprep.subr.bf16.mxu1 %v363_v0  ;;  %p334_p2 = scmp.ne.s32.totalorder %s237_s23, %s333_s24  ;;  %p339_p4 = scmp.lt.s32.totalorder %s333_s24, %s333_s24 }
  0x2e   :  { %278 = vmatprep.mubr.msk.bf16.mxu0 %vm364_vm0, %v363_v0  ;;  %275 = vmatpush3.bf16.msra.mxu0 %v173_v14 }
  0x2f   :  { %276 = vmatprep.subr.bf16.mxu0 %v363_v0  ;;  %p340_p5 = por %p339_p4, %p338_p3 }
  0x30   :  { %269 = vmatpush3.bf16.msra.mxu1 %v115_v11 }
  0x31   :  { %p341_p6 = pnand %p340_p5, %p334_p2 }
  0x32   :  { %277 = vmatpush3.bf16.msra.mxu0 %v174_v25 }
 0x100   :  { %v102_v16 = vpop.f32.mrb[0].mxu0 }
 0x101   :  { %v103_v17 = vadd.f32 %v246_v15, %v102_v16  ;;  %v264_v18 = vpop.f32.mrb[1].mxu0 }
 0x102   :  { %v105_v19 = vpop.f32.mrb[2].mxu0 }
 0x103   :  { %v108_v20 = vmax.f32 %v103_v17, 0.0  ;;  %v265_v21 = vpop.f32.mrb[3].mxu0 }
 0x105   :  { %v109_v22 = vpack.c.bf16 %v108_v20, %v108_v20 }
 0x107   :  { %271 = vmatmul.mubr.msk.bf16.vlgmr.msra.gmra.mrb[0].mxu1 %vm123_vm2, %v109_v22 }
 0x1da   :  { %v161_v27 = vpop.f32.mrb[0].mxu1 }
 0x1db   :  { %v162_v28 = vadd.f32 %v248_v26, %v161_v27  ;;  %v272_v29 = vpop.f32.mrb[1].mxu1 }
 0x1dc   :  { %v164_v30 = vpop.f32.mrb[2].mxu1 }
 0x1dd   :  { %v167_v31 = vmax.f32 %v162_v28, 0.0  ;;  %v273_v32 = vpop.f32.mrb[3].mxu1 }
 0x1df   :  { %v168_v33 = vpack.c.bf16 %v167_v31, %v167_v31 }
 0x1e1   :  { %279 = vmatmul.mubr.msk.bf16.vlgmr.msra.gmra.mrb[4].mxu0 %vm123_vm2, %v168_v33 }
 0x2b4   :  { %v219_v35 = vpop.f32.mrb[4].mxu0 }
 0x2b5   :  { %v220_v36 = vadd.f32 %v250_v34, %v219_v35  ;;  %v280_v37 = vpop.f32.mrb[5].mxu0 }
 0x2b6   :  { %v222_v38 = vpop.f32.mrb[6].mxu0 }
 0x2b7   :  { %287 = vtanh.f32 %v220_v36  ;;  %v281_v39 = vpop.f32.mrb[7].mxu0 }
 0x2c1   :  { %v288_v40 = vpop.eup %287 }
 0x2c2   :  { %v226_v41 = vmul.f32 0.5, %v288_v40 }
 0x2c4   :  { %v227_v42 = vadd.f32 0.5, %v226_v41 }
 0x2c6   :  { %229 = vst.msk [vmem:[#allocation7] sm:$0x3] %vm228_vm3, %v227_v42 }
 0x2c7   :  { %344 = shalt.err (!%p341_p6)
}
 0x2c8   :  { %s345_s25 = scalar_lea.hbm %s485_s7, 32 }
 0x2c9   :  { %p346_p7 = scmp.ne.s32.totalorder %s485_s7, %s345_s25  ;;  %p349_p8 = scmp.lt.u32.totalorder %s345_s25, %s485_s7 }
 0x2cb   :  { %p351_p9 = pnand %p349_p8, %p346_p7 }
 0x2cd   :  { %354 = shalt.err (!%p351_p9)
}
 0x2ce   :  { %239 = dma.vmem_to_hbm [thread:$0]  %s237_s23, 32, %s485_s7, [#allocation4]  }
 0x2cf   :  { %359 = dma.done.wait [#allocation4], 32  }
 0x2d0   :  { %360 = vsyncadd [#allocation4], 4294967264 }
 0x2d1   :  { %243 = vsyncpa [#allocation3], 1 }
 0x2d2   :  { %244 = vsyncpa [#allocation6], 1 }
 0x2d3   :  { %245 = vsyncpa [#allocation4], 1 }

</bundles_post_ra>
